<compile_context>
chip_gen: v6e
topology: v6e:2x2x1
jax: 0.10.0
libtpu: 0.0.40
codegen_flags: <defaults>
</compile_context>

<pallas_src>
import jax
import jax.numpy as jnp
from jax.experimental import pallas as pl
from jax.experimental.pallas import tpu as pltpu

HIDDEN = 128


def _discriminator_kernel(x_ref, w1_ref, b1_ref, w2_ref, b2_ref,
                          w3_ref, b3_ref, o_ref):
    # x_ref: (TILE_B, D) bf16   w1: (D, H) bf16   b1: (1, H) f32
    # w2: (H, H) bf16           b2: (1, H) f32
    # w3: (1, H) f32            b3: (1, 1) f32    o_ref: (TILE_B, 1) f32

    # Linear(data_dim, 128): bf16 operands on the MXU, f32 accumulate + f32 bias.
    h = jnp.dot(x_ref[...], w1_ref[...],
                preferred_element_type=jnp.float32) + b1_ref[...]
    # LeakyReLU(0.1): single VPU max, kept in f32.
    h = jnp.maximum(h, 0.1 * h)

    # Linear(128, 128): bf16 operands, f32 accumulate + f32 bias.
    h = jnp.dot(h.astype(jnp.bfloat16), w2_ref[...],
                preferred_element_type=jnp.float32) + b2_ref[...]

    # Head Linear(128, 1) + Sigmoid. An N=1 matmul wastes the MXU, so do it as a
    # VPU multiply + lane reduction in f32 (keepdims keeps everything 2-D).
    logit = jnp.sum(h * w3_ref[...], axis=-1, keepdims=True) + b3_ref[...]
    o_ref[...] = jax.nn.sigmoid(logit)
    # Note: the width-1 output store is masked (vst.msk) but only ~1 KB/tile and
    # fully hidden under the input DMA; a lane-dense (1, TILE_B) slab would need
    # an in-kernel relayout that isn't worth the lowering risk here.


def _round_up(n, m):
    return (n + m - 1) // m * m


@jax.jit
def discriminator_forward(x, params):
    """x: (B, data_dim) f32.  Returns sigmoid(head(...)) of shape (B, 1) f32."""
    w1, b1, w2, b2, w3, b3 = params
    B, D = x.shape
    H = w1.shape[1]

    # Batch tile: multiple of 256, capped at 512 rows (x tile <= 512*D bf16,
    # weights ~48 KiB bf16 -> trivially within 16/32 MiB scoped VMEM anywhere).
    tile_b = min(512, _round_up(B, 256))
    b_pad = _round_up(B, tile_b)

    # Pad the batch to a whole number of tiles; cast MXU operands to bf16 once
    # on the wrapper side (halves the dominant x HBM stream).
    x_p = jnp.pad(x, ((0, b_pad - B), (0, 0))).astype(jnp.bfloat16)
    w1_b = w1.astype(jnp.bfloat16)
    w2_b = w2.astype(jnp.bfloat16)
    w3_row = w3.reshape(1, H).astype(jnp.float32)   # head weight as (1, H) row
    b3_sc = b3.reshape(1, 1).astype(jnp.float32)

    out = pl.pallas_call(
        _discriminator_kernel,
        out_shape=jax.ShapeDtypeStruct((b_pad, 1), jnp.float32),
        grid=(b_pad // tile_b,),
        in_specs=[
            pl.BlockSpec((tile_b, D), lambda i: (i, 0)),   # x: batch-tiled
            pl.BlockSpec((D, H), lambda i: (0, 0)),        # w1: resident
            pl.BlockSpec((1, H), lambda i: (0, 0)),        # b1: resident
            pl.BlockSpec((H, H), lambda i: (0, 0)),        # w2: resident
            pl.BlockSpec((1, H), lambda i: (0, 0)),        # b2: resident
            pl.BlockSpec((1, H), lambda i: (0, 0)),        # w3 row: resident
            pl.BlockSpec((1, 1), lambda i: (0, 0)),        # b3: resident
        ],
        out_specs=pl.BlockSpec((tile_b, 1), lambda i: (i, 0)),
        compiler_params=pltpu.CompilerParams(
            dimension_semantics=("parallel",)),
    )(x_p, w1_b, b1, w2_b, b2, w3_row, b3_sc)

    return out[:B]                                         # drop padded rows


def init_params(key, data_dim, hidden=HIDDEN):
    """Deterministic synthetic parameters (shapes match the torch module)."""
    ks = jax.random.split(key, 6)

    def lin(kw, kb, fan_in, fan_out):
        bound = 1.0 / jnp.sqrt(fan_in)
        w = jax.random.uniform(kw, (fan_in, fan_out), jnp.float32, -bound, bound)
        b = jax.random.uniform(kb, (1, fan_out), jnp.float32, -bound, bound)
        return w, b

    w1, b1 = lin(ks[0], ks[1], data_dim, hidden)   # Linear(data_dim, 128)
    w2, b2 = lin(ks[2], ks[3], hidden, hidden)     # Linear(128, 128)
    w3, b3 = lin(ks[4], ks[5], hidden, 1)          # regular_gan Linear(128, 1)
    return (w1, b1, w2, b2, w3, b3)


def reference_forward(x, params):
    """Pure-f32 JAX reference (mirrors the torch forward)."""
    w1, b1, w2, b2, w3, b3 = params
    h = x @ w1 + b1
    h = jnp.where(h > 0, h, 0.1 * h)
    h = h @ w2 + b2
    return jax.nn.sigmoid(h @ w3 + b3)


if __name__ == "__main__":
    key = jax.random.PRNGKey(0)
    k_x, k_p = jax.random.split(key)

    batch, data_dim = 8, 32
    x = jax.random.normal(k_x, (batch, data_dim), jnp.float32)
    params = init_params(k_p, data_dim)

    out = jax.block_until_ready(discriminator_forward(x, params))
    ref = reference_forward(x, params)

    assert out.shape == (batch, 1)
    # bf16 MXU operands vs. a pure-f32 reference: loose tolerance (sigmoid output
    # error from bf16 matmul inputs is well under 1e-2 at these scales).
    assert jnp.allclose(out, ref, atol=2e-2, rtol=2e-2), \
        f"max abs err {jnp.max(jnp.abs(out - ref))}"

    print("KERNEL_OK")
</pallas_src>

<mosaic_0001>
module attributes {stable_mosaic.version = 11 : i64} {
  func.func @_discriminator_kernel(%arg0: i32, %arg1: memref<256x32xbf16, #tpu.memory_space<vmem>>, %arg2: memref<32x128xbf16, #tpu.memory_space<vmem>>, %arg3: memref<1x128xf32, #tpu.memory_space<vmem>>, %arg4: memref<128x128xbf16, #tpu.memory_space<vmem>>, %arg5: memref<1x128xf32, #tpu.memory_space<vmem>>, %arg6: memref<1x128xf32, #tpu.memory_space<vmem>>, %arg7: memref<1x1xf32, #tpu.memory_space<vmem>>, %arg8: memref<256x1xf32, #tpu.memory_space<vmem>>) attributes {dimension_semantics = [#tpu.dimension_semantics<parallel>], iteration_bounds = array<i64: 1>, scalar_prefetch = 0 : i64, scratch_operands = 0 : i64, tpu.core_type = #tpu.core_type<tc>, window_params = [{transform_indices = @transform_0, window_bounds = array<i64: 256, 32>}, {pipeline_mode = #tpu.pipeline_mode<synchronous>, transform_indices = @transform_1, window_bounds = array<i64: 32, 128>}, {pipeline_mode = #tpu.pipeline_mode<synchronous>, transform_indices = @transform_2, window_bounds = array<i64: 1, 128>}, {pipeline_mode = #tpu.pipeline_mode<synchronous>, transform_indices = @transform_3, window_bounds = array<i64: 128, 128>}, {pipeline_mode = #tpu.pipeline_mode<synchronous>, transform_indices = @transform_4, window_bounds = array<i64: 1, 128>}, {pipeline_mode = #tpu.pipeline_mode<synchronous>, transform_indices = @transform_5, window_bounds = array<i64: 1, 128>}, {pipeline_mode = #tpu.pipeline_mode<synchronous>, transform_indices = @transform_6, window_bounds = array<i64: 1, 1>}, {transform_indices = @transform_7, window_bounds = array<i64: 256, 1>}]} {
    %c0 = arith.constant 0 : index
    %c0_0 = arith.constant 0 : index
    %0 = vector.load %arg1[%c0, %c0_0] : memref<256x32xbf16, #tpu.memory_space<vmem>>, vector<256x32xbf16>
    %c0_1 = arith.constant 0 : index
    %c0_2 = arith.constant 0 : index
    %1 = vector.load %arg2[%c0_1, %c0_2] : memref<32x128xbf16, #tpu.memory_space<vmem>>, vector<32x128xbf16>
    %cst = arith.constant dense<0.000000e+00> : vector<256x128xf32>
    %2 = tpu.matmul %0, %1, %cst {dimension_numbers = #tpu.dot_dimension_numbers<[1], [0], [0], [1], [0, 0, 1, 1], [], []>} : vector<256x32xbf16>, vector<32x128xbf16>, vector<256x128xf32> -> vector<256x128xf32>
    %c0_3 = arith.constant 0 : index
    %c0_4 = arith.constant 0 : index
    %3 = vector.load %arg3[%c0_3, %c0_4] : memref<1x128xf32, #tpu.memory_space<vmem>>, vector<1x128xf32>
    %4 = vector.broadcast %3 : vector<1x128xf32> to vector<256x128xf32>
    %5 = arith.addf %2, %4 : vector<256x128xf32>
    %cst_5 = arith.constant 1.000000e-01 : f32
    %6 = vector.broadcast %cst_5 : f32 to vector<256x128xf32>
    %7 = arith.mulf %6, %5 : vector<256x128xf32>
    %8 = arith.maximumf %5, %7 : vector<256x128xf32>
    %9 = arith.truncf %8 : vector<256x128xf32> to vector<256x128xbf16>
    %c0_6 = arith.constant 0 : index
    %c0_7 = arith.constant 0 : index
    %10 = vector.load %arg4[%c0_6, %c0_7] : memref<128x128xbf16, #tpu.memory_space<vmem>>, vector<128x128xbf16>
    %cst_8 = arith.constant dense<0.000000e+00> : vector<256x128xf32>
    %11 = tpu.matmul %9, %10, %cst_8 {dimension_numbers = #tpu.dot_dimension_numbers<[1], [0], [0], [1], [0, 0, 1, 1], [], []>} : vector<256x128xbf16>, vector<128x128xbf16>, vector<256x128xf32> -> vector<256x128xf32>
    %c0_9 = arith.constant 0 : index
    %c0_10 = arith.constant 0 : index
    %12 = vector.load %arg5[%c0_9, %c0_10] : memref<1x128xf32, #tpu.memory_space<vmem>>, vector<1x128xf32>
    %13 = vector.broadcast %12 : vector<1x128xf32> to vector<256x128xf32>
    %14 = arith.addf %11, %13 : vector<256x128xf32>
    %c0_11 = arith.constant 0 : index
    %c0_12 = arith.constant 0 : index
    %15 = vector.load %arg6[%c0_11, %c0_12] : memref<1x128xf32, #tpu.memory_space<vmem>>, vector<1x128xf32>
    %16 = vector.broadcast %15 : vector<1x128xf32> to vector<256x128xf32>
    %17 = arith.mulf %14, %16 : vector<256x128xf32>
    %cst_13 = arith.constant dense<0.000000e+00> : vector<256xf32>
    %18 = vector.multi_reduction <add>, %17, %cst_13 [1] : vector<256x128xf32> to vector<256xf32>
    %19 = vector.shape_cast %18 : vector<256xf32> to vector<256x1xf32>
    %c0_14 = arith.constant 0 : index
    %c0_15 = arith.constant 0 : index
    %20 = vector.load %arg7[%c0_14, %c0_15] : memref<1x1xf32, #tpu.memory_space<vmem>>, vector<1x1xf32>
    %21 = vector.broadcast %20 : vector<1x1xf32> to vector<256x1xf32>
    %22 = arith.addf %19, %21 : vector<256x1xf32>
    %23 = arith.negf %22 : vector<256x1xf32>
    %24 = math.exp %23 : vector<256x1xf32>
    %cst_16 = arith.constant 1.000000e+00 : f32
    %25 = vector.broadcast %cst_16 : f32 to vector<256x1xf32>
    %26 = arith.addf %25, %24 : vector<256x1xf32>
    %27 = arith.divf %25, %26 : vector<256x1xf32>
    %c0_17 = arith.constant 0 : index
    %c0_18 = arith.constant 0 : index
    %28 = vector.load %arg8[%c0_17, %c0_18] : memref<256x1xf32, #tpu.memory_space<vmem>>, vector<256x1xf32>
    tpu.vector_store %arg8[%c0_17, %c0_18], %27 {strides = array<i32>} : memref<256x1xf32, #tpu.memory_space<vmem>>, vector<256x1xf32>,
    return
  }
  func.func @transform_0(%arg0: i32) -> (i32, i32) {
    %c0_i32 = arith.constant 0 : i32
    %c0_i32_0 = arith.constant 0 : i32
    return %arg0, %c0_i32 : i32, i32
  }
  func.func @transform_1(%arg0: i32) -> (i32, i32) {
    %c0_i32 = arith.constant 0 : i32
    %c0_i32_0 = arith.constant 0 : i32
    %c0_i32_1 = arith.constant 0 : i32
    return %c0_i32, %c0_i32_0 : i32, i32
  }
  func.func @transform_2(%arg0: i32) -> (i32, i32) {
    %c0_i32 = arith.constant 0 : i32
    %c0_i32_0 = arith.constant 0 : i32
    %c0_i32_1 = arith.constant 0 : i32
    return %c0_i32, %c0_i32_0 : i32, i32
  }
  func.func @transform_3(%arg0: i32) -> (i32, i32) {
    %c0_i32 = arith.constant 0 : i32
    %c0_i32_0 = arith.constant 0 : i32
    %c0_i32_1 = arith.constant 0 : i32
    return %c0_i32, %c0_i32_0 : i32, i32
  }
  func.func @transform_4(%arg0: i32) -> (i32, i32) {
    %c0_i32 = arith.constant 0 : i32
    %c0_i32_0 = arith.constant 0 : i32
    %c0_i32_1 = arith.constant 0 : i32
    return %c0_i32, %c0_i32_0 : i32, i32
  }
  func.func @transform_5(%arg0: i32) -> (i32, i32) {
    %c0_i32 = arith.constant 0 : i32
    %c0_i32_0 = arith.constant 0 : i32
    %c0_i32_1 = arith.constant 0 : i32
    return %c0_i32, %c0_i32_0 : i32, i32
  }
  func.func @transform_6(%arg0: i32) -> (i32, i32) {
    %c0_i32 = arith.constant 0 : i32
    %c0_i32_0 = arith.constant 0 : i32
    %c0_i32_1 = arith.constant 0 : i32
    return %c0_i32, %c0_i32_0 : i32, i32
  }
  func.func @transform_7(%arg0: i32) -> (i32, i32) {
    %c0_i32 = arith.constant 0 : i32
    %c0_i32_0 = arith.constant 0 : i32
    return %arg0, %c0_i32 : i32, i32
  }
}

</mosaic_0001>

<bundles_post_ra>
// kernel: discriminator_forward.1
= control target key start
LH: loop header
LB: loop body
LE: loop exit
PB: predicated region body
PF: predicated region fallthrough
CT: control target
= control target key end

     0   :  { %vm164_vm0 = vcmask 261120   ;;  %vm1020_vm1 = vcmask 7168   ;;  %s1841_s1 = inlined_call_operand.vmem [shape: bf16[32,128], index: 1, kind: input, shape index: {}]   ;;  %s1842_s0 = inlined_call_operand.vmem [shape: bf16[256,32], index: 0, kind: input, shape index: {}]   ;;  %s1843_s3 = inlined_call_operand.vmem [shape: bf16[128,128], index: 3, kind: input, shape index: {}]   ;;  %s1844_s2 = inlined_call_operand.vmem [shape: f32[1,128], index: 2, kind: input, shape index: {}]   ;;  %s1845_s6 = inlined_call_operand.<no memory space> [shape: f32[1,1], index: 6, kind: input, shape index: {}]   ;;  %s1846_s4 = inlined_call_operand.vmem [shape: f32[1,128], index: 4, kind: input, shape index: {}]   ;;  %s1847_s5 = inlined_call_operand.vmem [shape: f32[1,128], index: 5, kind: input, shape index: {}]   ;;  %s1848_s7 = inlined_call_operand.vmem [shape: f32[256,1], index: 7, kind: output, shape index: {}]  }
   0x1   :  { %v1277_v0 = vld [vmem:[%s1841_s1 + $0x8] sm:$0xff]   ;;  %v1278_v1 = vld [vmem:[%s1841_s1] sm:$0xff]   ;;  %v1281_v4 = vld [vmem:[%s1842_s0 + $0x10] sm:$0xff]  }
   0x2   :  { %1177 = vmatprep.subr.bf16.mxu0 %v1277_v0  ;;  %v1279_v2 = vld [vmem:[%s1842_s0] sm:$0xff]   ;;  %v1280_v3 = vld [vmem:[%s1842_s0 + $0x8] sm:$0xff]   ;;  %v1282_v5 = vld [vmem:[%s1842_s0 + $0x18] sm:$0xff]  }
   0x3   :  { %1178 = vmatpush3.bf16.msra.mxu0 %v1277_v0  ;;  %1181 = vmatprep.mubr.msk.bf16.mxu0 %vm164_vm0, %v1279_v2  ;;  %v1283_v6 = vld [vmem:[%s1842_s0 + $0x20] sm:$0xff]   ;;  %v1295_v7 = vld [vmem:[%s1843_s3 + $0x38] sm:$0xff]   ;;  %v1296_v8 = vld [vmem:[%s1843_s3 + $0x30] sm:$0xff]  }
   0x4   :  { %1179 = vmatprep.subr.bf16.mxu0 %v1278_v1  ;;  %1261 = vmatprep.subr.bf16.mxu1 %v1295_v7  ;;  %v1284_v9 = vld [vmem:[%s1842_s0 + $0x28] sm:$0xff]   ;;  %v1285_v11 = vld [vmem:[%s1842_s0 + $0x30] sm:$0xff]   ;;  %v1298_v12 = vld [vmem:[%s1843_s3 + $0x20] sm:$0xff]  }
   0x5   :  { %1269 = vmatpush3.bf16.msra.mxu1 %v1295_v7  ;;  %v1297_v10 = vld [vmem:[%s1843_s3 + $0x28] sm:$0xff]   ;;  %v1286_v13 = vld [vmem:[%s1842_s0 + $0x38] sm:$0xff]   ;;  %v1287_v15 = vld [vmem:[%s1842_s0 + $0x40] sm:$0xff]  }
   0x6   :  { %1262 = vmatprep.subr.bf16.mxu1 %v1296_v8  ;;  %v1299_v14 = vld [vmem:[%s1843_s3 + $0x18] sm:$0xff]   ;;  %v1300_v16 = vld [vmem:[%s1843_s3 + $0x10] sm:$0xff]   ;;  %v1288_v17 = vld [vmem:[%s1842_s0 + $0x48] sm:$0xff]  }
   0x7   :  { %1180 = vmatpush3.bf16.msra.mxu0 %v1278_v1  ;;  %v1289_v18 = vld [vmem:[%s1842_s0 + $0x50] sm:$0xff]   ;;  %v1290_v19 = vld [vmem:[%s1842_s0 + $0x58] sm:$0xff]   ;;  %v1291_v20 = vld [vmem:[%s1842_s0 + $0x60] sm:$0xff]  }
   0x8   :  { %1213 = vmatprep.subr.bf16.mxu0 %v1295_v7  ;;  %v1292_v21 = vld [vmem:[%s1842_s0 + $0x68] sm:$0xff]   ;;  %v1293_v22 = vld [vmem:[%s1842_s0 + $0x70] sm:$0xff]   ;;  %v1294_v23 = vld [vmem:[%s1842_s0 + $0x78] sm:$0xff]  }
   0x9   :  { %1270 = vmatpush3.bf16.msra.mxu1 %v1296_v8  ;;  %v1301_v24 = vld [vmem:[%s1843_s3 + $0x8] sm:$0xff]   ;;  %v1302_v25 = vld [vmem:[%s1843_s3] sm:$0xff]  }
   0xa   :  { %1182 = vmatmul.mubr.msk.bf16.vlgmr.msra.gmra.mxu0 %vm164_vm0, %v1280_v3  ;;  %1263 = vmatprep.subr.bf16.mxu1 %v1297_v10  ;;  %v1568_v27 = vld [vmem:[%s1844_s2] ss:$0 sm:$0xff] }
   0xb   :  { %1185 = vmatprep.mubr.msk.bf16.mxu0 %vm164_vm0, %v1281_v4  ;;  %1214 = vmatpush3.bf16.msra.mxu0 %v1295_v7 }
   0xc   :  { %1215 = vmatprep.subr.bf16.mxu0 %v1296_v8 }
   0xd   :  { %1271 = vmatpush3.bf16.msra.mxu1 %v1297_v10 }
   0xe   :  { %1264 = vmatprep.subr.bf16.mxu1 %v1298_v12 }
   0xf   :  { %1216 = vmatpush3.bf16.msra.mxu0 %v1296_v8 }
  0x10   :  { %1217 = vmatprep.subr.bf16.mxu0 %v1297_v10 }
  0x11   :  { %1272 = vmatpush3.bf16.msra.mxu1 %v1298_v12 }
  0x12   :  { %1186 = vmatmul.mubr.msk.bf16.gmra.mxu0 %vm164_vm0, %v1282_v5  ;;  %1265 = vmatprep.subr.bf16.mxu1 %v1299_v14 }
  0x13   :  { %1189 = vmatprep.mubr.msk.bf16.mxu0 %vm164_vm0, %v1283_v6  ;;  %1218 = vmatpush3.bf16.msra.mxu0 %v1297_v10 }
  0x14   :  { %1219 = vmatprep.subr.bf16.mxu0 %v1298_v12 }
  0x15   :  { %1273 = vmatpush3.bf16.msra.mxu1 %v1299_v14 }
  0x16   :  { %1266 = vmatprep.subr.bf16.mxu1 %v1300_v16 }
  0x17   :  { %1220 = vmatpush3.bf16.msra.mxu0 %v1298_v12 }
  0x18   :  { %1221 = vmatprep.subr.bf16.mxu0 %v1299_v14 }
  0x19   :  { %1274 = vmatpush3.bf16.msra.mxu1 %v1300_v16 }
  0x1a   :  { %1190 = vmatmul.mubr.msk.bf16.gmra.mxu0 %vm164_vm0, %v1284_v9  ;;  %1267 = vmatprep.subr.bf16.mxu1 %v1301_v24 }
  0x1b   :  { %1193 = vmatprep.mubr.msk.bf16.mxu0 %vm164_vm0, %v1285_v11  ;;  %1222 = vmatpush3.bf16.msra.mxu0 %v1299_v14 }
  0x1c   :  { %1223 = vmatprep.subr.bf16.mxu0 %v1300_v16 }
  0x1d   :  { %1275 = vmatpush3.bf16.msra.mxu1 %v1301_v24 }
  0x1e   :  { %1268 = vmatprep.subr.bf16.mxu1 %v1302_v25 }
  0x1f   :  { %1224 = vmatpush3.bf16.msra.mxu0 %v1300_v16 }
  0x20   :  { %1225 = vmatprep.subr.bf16.mxu0 %v1301_v24 }
  0x21   :  { %1276 = vmatpush3.bf16.msra.mxu1 %v1302_v25 }
  0x22   :  { %1194 = vmatmul.mubr.msk.bf16.gmra.mxu0 %vm164_vm0, %v1286_v13 }
  0x23   :  { %1197 = vmatprep.mubr.msk.bf16.mxu0 %vm164_vm0, %v1287_v15  ;;  %1226 = vmatpush3.bf16.msra.mxu0 %v1301_v24 }
  0x24   :  { %1227 = vmatprep.subr.bf16.mxu0 %v1302_v25 }
  0x27   :  { %1228 = vmatpush3.bf16.msra.mxu0 %v1302_v25 }
  0x2a   :  { %1198 = vmatmul.mubr.msk.bf16.gmra.mxu0 %vm164_vm0, %v1288_v17 }
  0x2b   :  { %1201 = vmatprep.mubr.msk.bf16.mxu0 %vm164_vm0, %v1289_v18 }
  0x32   :  { %1202 = vmatmul.mubr.msk.bf16.gmra.mxu0 %vm164_vm0, %v1290_v19 }
  0x33   :  { %1205 = vmatprep.mubr.msk.bf16.mxu0 %vm164_vm0, %v1291_v20 }
  0x3a   :  { %1206 = vmatmul.mubr.msk.bf16.gmra.mxu0 %vm164_vm0, %v1292_v21 }
  0x3b   :  { %1209 = vmatprep.mubr.msk.bf16.mxu0 %vm164_vm0, %v1293_v22 }
  0x42   :  { %1210 = vmatmul.mubr.msk.bf16.gmra.mxu0 %vm164_vm0, %v1294_v23 }
  0xca   :  { %v1183_v26 = vpop.f32.mrf.mxu0 }
  0xcb   :  { %v256_v30 = vadd.f32 %v1183_v26, %v1568_v27 }
  0xcc   :  { %v247_v28 = vpop.f32.mrf.mxu0 }
  0xcd   :  { %v248_v29 = vadd.f32 %v1568_v27, %v247_v28  ;;  %v376_v37 = vmul.f32 0.1, %v256_v30 }
  0xce   :  { %v1184_v31 = vpop.f32.mrf.mxu0 }
  0xcf   :  { %v259_v32 = vadd.f32 %v1184_v31, %v1568_v27  ;;  %v374_v34 = vmul.f32 0.1, %v248_v29  ;;  %v408_v45 = vmax.f32 %v256_v30, %v376_v37 }
  0xd0   :  { %v250_v33 = vpop.f32.mrf.mxu0 }
  0xd1   :  { %v377_v35 = vmul.f32 0.1, %v259_v32  ;;  %v251_v36 = vadd.f32 %v1568_v27, %v250_v33  ;;  %v406_v42 = vmax.f32 %v248_v29, %v374_v34 }
  0xd2   :  { %v1187_v38 = vpop.f32.mrf.mxu0 }
  0xd3   :  { %v375_v39 = vmul.f32 0.1, %v251_v36  ;;  %v409_v40 = vmax.f32 %v259_v32, %v377_v35  ;;  %v272_v46 = vadd.f32 %v1187_v38, %v1568_v27 }
  0xd4   :  { %v263_v41 = vpop.f32.mrf.mxu0 }
  0xd5   :  { %v407_v43 = vmax.f32 %v251_v36, %v375_v39  ;;  %v264_v44 = vadd.f32 %v1568_v27, %v263_v41  ;;  %v439_v50 = vpack.c.bf16 %v409_v40, %v408_v45  ;;  %v380_v55 = vmul.f32 0.1, %v272_v46 }
  0xd6   :  { %v1188_v47 = vpop.f32.mrf.mxu0 }
  0xd7   :  { %v275_v48 = vadd.f32 %v1188_v47, %v1568_v27  ;;  %v438_v49 = vpack.c.bf16 %v407_v43, %v406_v42  ;;  %v378_v52 = vmul.f32 0.1, %v264_v44  ;;  %v412_v63 = vmax.f32 %v272_v46, %v380_v55 }
  0xd8   :  { %v266_v51 = vpop.f32.mrf.mxu0 }
  0xd9   :  { %v381_v53 = vmul.f32 0.1, %v275_v48  ;;  %v267_v54 = vadd.f32 %v1568_v27, %v266_v51  ;;  %1229 = vmatprep.mubr.bf16.mxu0 %v438_v49  ;;  %v410_v61 = vmax.f32 %v264_v44, %v378_v52 }
  0xda   :  { %v1191_v56 = vpop.f32.mrf.mxu0  ;;  %1230 = vmatmul.mubr.bf16.vlgmr.msra.gmra.mxu0 %v439_v50 }
  0xdb   :  { %v379_v57 = vmul.f32 0.1, %v267_v54  ;;  %v413_v58 = vmax.f32 %v275_v48, %v381_v53  ;;  %v288_v0 = vadd.f32 %v1191_v56, %v1568_v27 }
  0xdc   :  { %v279_v59 = vpop.f32.mrf.mxu0 }
  0xdd   :  { %v280_v60 = vadd.f32 %v1568_v27, %v279_v59  ;;  %v411_v62 = vmax.f32 %v267_v54, %v379_v57  ;;  %v441_v5 = vpack.c.bf16 %v413_v58, %v412_v63  ;;  %v384_v9 = vmul.f32 0.1, %v288_v0 }
  0xde   :  { %v1192_v1 = vpop.f32.mrf.mxu0 }
  0xdf   :  { %v291_v2 = vadd.f32 %v1192_v1, %v1568_v27  ;;  %v440_v3 = vpack.c.bf16 %v411_v62, %v410_v61  ;;  %v382_v6 = vmul.f32 0.1, %v280_v60  ;;  %v416_v17 = vmax.f32 %v288_v0, %v384_v9 }
  0xe0   :  { %v282_v4 = vpop.f32.mrf.mxu0 }
  0xe1   :  { %v385_v7 = vmul.f32 0.1, %v291_v2  ;;  %v283_v8 = vadd.f32 %v1568_v27, %v282_v4  ;;  %1233 = vmatprep.mubr.bf16.mxu1 %v440_v3  ;;  %v414_v14 = vmax.f32 %v280_v60, %v382_v6 }
  0xe2   :  { %v1195_v10 = vpop.f32.mrf.mxu0  ;;  %1234 = vmatmul.mubr.bf16.vlgmr.msra.gmra.mxu1 %v441_v5 }
  0xe3   :  { %v383_v11 = vmul.f32 0.1, %v283_v8  ;;  %v417_v12 = vmax.f32 %v291_v2, %v385_v7  ;;  %v304_v18 = vadd.f32 %v1195_v10, %v1568_v27 }
  0xe4   :  { %v295_v13 = vpop.f32.mrf.mxu0 }
  0xe5   :  { %v415_v15 = vmax.f32 %v283_v8, %v383_v11  ;;  %v296_v16 = vadd.f32 %v1568_v27, %v295_v13  ;;  %v443_v23 = vpack.c.bf16 %v417_v12, %v416_v17  ;;  %v388_v28 = vmul.f32 0.1, %v304_v18 }
  0xe6   :  { %v1196_v19 = vpop.f32.mrf.mxu0 }
  0xe7   :  { %v307_v20 = vadd.f32 %v1196_v19, %v1568_v27  ;;  %v442_v21 = vpack.c.bf16 %v415_v15, %v414_v14  ;;  %v386_v24 = vmul.f32 0.1, %v296_v16  ;;  %v420_v36 = vmax.f32 %v304_v18, %v388_v28 }
  0xe8   :  { %v298_v22 = vpop.f32.mrf.mxu0 }
  0xe9   :  { %v389_v25 = vmul.f32 0.1, %v307_v20  ;;  %v299_v26 = vadd.f32 %v1568_v27, %v298_v22  ;;  %1237 = vmatprep.mubr.bf16.mxu1 %v442_v21  ;;  %v418_v33 = vmax.f32 %v296_v16, %v386_v24 }
  0xea   :  { %v1199_v29 = vpop.f32.mrf.mxu0  ;;  %1238 = vmatmul.mubr.bf16.gmra.mxu1 %v443_v23 }
  0xeb   :  { %v387_v30 = vmul.f32 0.1, %v299_v26  ;;  %v421_v31 = vmax.f32 %v307_v20, %v389_v25  ;;  %v320_v37 = vadd.f32 %v1199_v29, %v1568_v27 }
  0xec   :  { %v311_v32 = vpop.f32.mrf.mxu0 }
  0xed   :  { %v419_v34 = vmax.f32 %v299_v26, %v387_v30  ;;  %v312_v35 = vadd.f32 %v1568_v27, %v311_v32  ;;  %v445_v42 = vpack.c.bf16 %v421_v31, %v420_v36  ;;  %v392_v46 = vmul.f32 0.1, %v320_v37 }
  0xee   :  { %v1200_v38 = vpop.f32.mrf.mxu0 }
  0xef   :  { %v323_v39 = vadd.f32 %v1200_v38, %v1568_v27  ;;  %v444_v40 = vpack.c.bf16 %v419_v34, %v418_v33  ;;  %v390_v43 = vmul.f32 0.1, %v312_v35  ;;  %v424_v54 = vmax.f32 %v320_v37, %v392_v46 }
  0xf0   :  { %v314_v41 = vpop.f32.mrf.mxu0 }
  0xf1   :  { %v393_v44 = vmul.f32 0.1, %v323_v39  ;;  %v315_v45 = vadd.f32 %v1568_v27, %v314_v41  ;;  %1241 = vmatprep.mubr.bf16.mxu1 %v444_v40  ;;  %v422_v51 = vmax.f32 %v312_v35, %v390_v43 }
  0xf2   :  { %v1203_v47 = vpop.f32.mrf.mxu0  ;;  %1242 = vmatmul.mubr.bf16.gmra.mxu1 %v445_v42 }
  0xf3   :  { %v391_v48 = vmul.f32 0.1, %v315_v45  ;;  %v425_v49 = vmax.f32 %v323_v39, %v393_v44  ;;  %v336_v55 = vadd.f32 %v1203_v47, %v1568_v27  ;;  %v1613_v47 = vld [vmem:[%s1847_s5] ss:$0 sm:$0xff] }
  0xf4   :  { %v327_v50 = vpop.f32.mrf.mxu0 }
  0xf5   :  { %v423_v52 = vmax.f32 %v315_v45, %v391_v48  ;;  %v328_v53 = vadd.f32 %v1568_v27, %v327_v50  ;;  %v447_v60 = vpack.c.bf16 %v425_v49, %v424_v54  ;;  %v396_v0 = vmul.f32 0.1, %v336_v55 }
  0xf6   :  { %v1204_v56 = vpop.f32.mrf.mxu0  ;;  %v12_v45 = vstv %s1845_s6 }
  0xf7   :  { %v339_v57 = vadd.f32 %v1204_v56, %v1568_v27  ;;  %v446_v58 = vpack.c.bf16 %v423_v52, %v422_v51  ;;  %v394_v61 = vmul.f32 0.1, %v328_v53  ;;  %v428_v8 = vmax.f32 %v336_v55, %v396_v0  ;;  %13 = vst [vmem:[#allocation2] sm:$0x1] %v12_v45 }
  0xf8   :  { %v330_v59 = vpop.f32.mrf.mxu0 }
  0xf9   :  { %v397_v62 = vmul.f32 0.1, %v339_v57  ;;  %v331_v63 = vadd.f32 %v1568_v27, %v330_v59  ;;  %1245 = vmatprep.mubr.bf16.mxu1 %v446_v58  ;;  %v426_v5 = vmax.f32 %v328_v53, %v394_v61 }
  0xfa   :  { %v1207_v1 = vpop.f32.mrf.mxu0  ;;  %1246 = vmatmul.mubr.bf16.gmra.mxu1 %v447_v60 }
  0xfb   :  { %v395_v2 = vmul.f32 0.1, %v331_v63  ;;  %v429_v3 = vmax.f32 %v339_v57, %v397_v62  ;;  %v352_v9 = vadd.f32 %v1207_v1, %v1568_v27 }
  0xfc   :  { %v343_v4 = vpop.f32.mrf.mxu0 }
  0xfd   :  { %v427_v6 = vmax.f32 %v331_v63, %v395_v2  ;;  %v344_v7 = vadd.f32 %v1568_v27, %v343_v4  ;;  %v449_v14 = vpack.c.bf16 %v429_v3, %v428_v8  ;;  %v400_v18 = vmul.f32 0.1, %v352_v9 }
  0xfe   :  { %v1208_v10 = vpop.f32.mrf.mxu0 }
  0xff   :  { %v355_v11 = vadd.f32 %v1208_v10, %v1568_v27  ;;  %v448_v12 = vpack.c.bf16 %v427_v6, %v426_v5  ;;  %v398_v15 = vmul.f32 0.1, %v344_v7  ;;  %v432_v26 = vmax.f32 %v352_v9, %v400_v18 }
 0x100   :  { %v346_v13 = vpop.f32.mrf.mxu0 }
 0x101   :  { %v401_v16 = vmul.f32 0.1, %v355_v11  ;;  %v347_v17 = vadd.f32 %v1568_v27, %v346_v13  ;;  %1249 = vmatprep.mubr.bf16.mxu1 %v448_v12  ;;  %v430_v23 = vmax.f32 %v344_v7, %v398_v15 }
 0x102   :  { %v1211_v19 = vpop.f32.mrf.mxu0  ;;  %1250 = vmatmul.mubr.bf16.gmra.mxu1 %v449_v14 }
 0x103   :  { %v399_v20 = vmul.f32 0.1, %v347_v17  ;;  %v433_v21 = vmax.f32 %v355_v11, %v401_v16  ;;  %v368_v28 = vadd.f32 %v1211_v19, %v1568_v27 }
 0x104   :  { %v359_v22 = vpop.f32.mrf.mxu0 }
 0x105   :  { %v431_v24 = vmax.f32 %v347_v17, %v399_v20  ;;  %v360_v25 = vadd.f32 %v1568_v27, %v359_v22  ;;  %v451_v33 = vpack.c.bf16 %v433_v21, %v432_v26  ;;  %v404_v37 = vmul.f32 0.1, %v368_v28 }
 0x106   :  { %v1212_v29 = vpop.f32.mrf.mxu0 }
 0x107   :  { %v371_v30 = vadd.f32 %v1212_v29, %v1568_v27  ;;  %v450_v31 = vpack.c.bf16 %v431_v24, %v430_v23  ;;  %v402_v34 = vmul.f32 0.1, %v360_v25  ;;  %v436_v42 = vmax.f32 %v368_v28, %v404_v37 }
 0x108   :  { %v362_v32 = vpop.f32.mrf.mxu0 }
 0x109   :  { %v405_v35 = vmul.f32 0.1, %v371_v30  ;;  %v363_v36 = vadd.f32 %v1568_v27, %v362_v32  ;;  %1253 = vmatprep.mubr.bf16.mxu1 %v450_v31  ;;  %v434_v40 = vmax.f32 %v360_v25, %v402_v34  ;;  %v1608_v27 = vld [vmem:[%s1846_s4] ss:$0 sm:$0xff] }
 0x10a   :  { %1254 = vmatmul.mubr.bf16.gmra.mxu1 %v451_v33 }
 0x10b   :  { %v403_v38 = vmul.f32 0.1, %v363_v36  ;;  %v437_v39 = vmax.f32 %v371_v30, %v405_v35 }
 0x10d   :  { %v435_v41 = vmax.f32 %v363_v36, %v403_v38  ;;  %v453_v44 = vpack.c.bf16 %v437_v39, %v436_v42 }
 0x10f   :  { %v452_v43 = vpack.c.bf16 %v435_v41, %v434_v40 }
 0x111   :  { %1257 = vmatprep.mubr.bf16.mxu1 %v452_v43 }
 0x112   :  { %1258 = vmatmul.mubr.bf16.gmra.mxu1 %v453_v44 }
 0x19a   :  { %v1231_v46 = vpop.f32.mrf.mxu0 }
 0x19b   :  { %v568_v48 = vadd.f32 %v1231_v46, %v1608_v27 }
 0x19c   :  { %v559_v49 = vpop.f32.mrf.mxu0 }
 0x19d   :  { %v560_v50 = vadd.f32 %v1608_v27, %v559_v49  ;;  %v695_v51 = vmul.f32 %v1613_v47, %v568_v48 }
 0x19e   :  { %v1232_v52 = vpop.f32.mrf.mxu0 }
 0x19f   :  { %v571_v53 = vadd.f32 %v1232_v52, %v1608_v27  ;;  %729 = vadd.xlane.f32.xlu1 %v695_v51  ;;  %v693_v54 = vmul.f32 %v1613_v47, %v560_v50 }
 0x1a0   :  { %v562_v55 = vpop.f32.mrf.mxu0 }
 0x1a1   :  { %v563_v56 = vadd.f32 %v1608_v27, %v562_v55  ;;  %725 = vadd.xlane.f32.xlu0 %v693_v54  ;;  %v696_v57 = vmul.f32 %v1613_v47, %v571_v53 }
 0x1a2   :  { %v1235_v58 = vpop.f32.mrf.mxu1 }
 0x1a3   :  { %v584_v59 = vadd.f32 %v1235_v58, %v1608_v27  ;;  %731 = vadd.xlane.f32.xlu1 %v696_v57  ;;  %v694_v60 = vmul.f32 %v1613_v47, %v563_v56 }
 0x1a4   :  { %v575_v61 = vpop.f32.mrf.mxu1 }
 0x1a5   :  { %727 = vadd.xlane.f32.xlu0 %v694_v60  ;;  %v576_v63 = vadd.f32 %v1608_v27, %v575_v61  ;;  %v699_v1 = vmul.f32 %v1613_v47, %v584_v59 }
 0x1a6   :  { %v1236_v62 = vpop.f32.mrf.mxu1 }
 0x1a7   :  { %v587_v0 = vadd.f32 %v1236_v62, %v1608_v27  ;;  %v697_v7 = vmul.f32 %v1613_v47, %v576_v63 }
 0x1a8   :  { %v578_v2 = vpop.f32.mrf.mxu1 }
 0x1a9   :  { %v579_v3 = vadd.f32 %v1608_v27, %v578_v2  ;;  %737 = vadd.xlane.f32.xlu0 %v699_v1  ;;  %v700_v4 = vmul.f32 %v1613_v47, %v587_v0 }
 0x1aa   :  { %v1239_v5 = vpop.f32.mrf.mxu1 }
 0x1ab   :  { %v600_v6 = vadd.f32 %v1239_v5, %v1608_v27  ;;  %739 = vadd.xlane.f32.xlu1 %v700_v4  ;;  %v698_v9 = vmul.f32 %v1613_v47, %v579_v3 }
 0x1ac   :  { %v591_v8 = vpop.f32.mrf.mxu1 }
 0x1ad   :  { %733 = vadd.xlane.f32.xlu0 %v697_v7  ;;  %v592_v11 = vadd.f32 %v1608_v27, %v591_v8  ;;  %v703_v13 = vmul.f32 %v1613_v47, %v600_v6 }
 0x1ae   :  { %v1240_v10 = vpop.f32.mrf.mxu1 }
 0x1af   :  { %v603_v12 = vadd.f32 %v1240_v10, %v1608_v27  ;;  %735 = vadd.xlane.f32.xlu1 %v698_v9  ;;  %v701_v19 = vmul.f32 %v1613_v47, %v592_v11 }
 0x1b0   :  { %v594_v14 = vpop.f32.mrf.mxu1 }
 0x1b1   :  { %v595_v15 = vadd.f32 %v1608_v27, %v594_v14  ;;  %745 = vadd.xlane.f32.xlu0 %v703_v13  ;;  %v704_v16 = vmul.f32 %v1613_v47, %v603_v12 }
 0x1b2   :  { %v1243_v17 = vpop.f32.mrf.mxu1 }
 0x1b3   :  { %v616_v18 = vadd.f32 %v1243_v17, %v1608_v27  ;;  %747 = vadd.xlane.f32.xlu1 %v704_v16  ;;  %v702_v21 = vmul.f32 %v1613_v47, %v595_v15  ;;  %v1679_v17 = vld [vmem:[#allocation2] ss:$0 sm:$0xff] }
 0x1b4   :  { %v607_v20 = vpop.f32.mrf.mxu1 }
 0x1b5   :  { %741 = vadd.xlane.f32.xlu0 %v701_v19  ;;  %v608_v23 = vadd.f32 %v1608_v27, %v607_v20  ;;  %v707_v25 = vmul.f32 %v1613_v47, %v616_v18 }
 0x1b6   :  { %v1244_v22 = vpop.f32.mrf.mxu1 }
 0x1b7   :  { %v619_v24 = vadd.f32 %v1244_v22, %v1608_v27  ;;  %743 = vadd.xlane.f32.xlu1 %v702_v21  ;;  %v705_v32 = vmul.f32 %v1613_v47, %v608_v23 }
 0x1b8   :  { %v610_v26 = vpop.f32.mrf.mxu1 }
 0x1b9   :  { %v611_v28 = vadd.f32 %v1608_v27, %v610_v26  ;;  %753 = vadd.xlane.f32.xlu0 %v707_v25  ;;  %v708_v29 = vmul.f32 %v1613_v47, %v619_v24 }
 0x1ba   :  { %v1247_v30 = vpop.f32.mrf.mxu1 }
 0x1bb   :  { %v632_v31 = vadd.f32 %v1247_v30, %v1608_v27  ;;  %755 = vadd.xlane.f32.xlu1 %v708_v29  ;;  %v706_v34 = vmul.f32 %v1613_v47, %v611_v28 }
 0x1bc   :  { %v623_v33 = vpop.f32.mrf.mxu1 }
 0x1bd   :  { %749 = vadd.xlane.f32.xlu0 %v705_v32  ;;  %v624_v36 = vadd.f32 %v1608_v27, %v623_v33  ;;  %v711_v38 = vmul.f32 %v1613_v47, %v632_v31 }
 0x1be   :  { %v1248_v35 = vpop.f32.mrf.mxu1 }
 0x1bf   :  { %v635_v37 = vadd.f32 %v1248_v35, %v1608_v27  ;;  %751 = vadd.xlane.f32.xlu1 %v706_v34  ;;  %v709_v44 = vmul.f32 %v1613_v47, %v624_v36 }
 0x1c0   :  { %v626_v39 = vpop.f32.mrf.mxu1 }
 0x1c1   :  { %v627_v40 = vadd.f32 %v1608_v27, %v626_v39  ;;  %761 = vadd.xlane.f32.xlu0 %v711_v38  ;;  %v712_v41 = vmul.f32 %v1613_v47, %v635_v37 }
 0x1c2   :  { %v1251_v42 = vpop.f32.mrf.mxu1 }
 0x1c3   :  { %v648_v43 = vadd.f32 %v1251_v42, %v1608_v27  ;;  %763 = vadd.xlane.f32.xlu1 %v712_v41  ;;  %v710_v46 = vmul.f32 %v1613_v47, %v627_v40 }
 0x1c4   :  { %v639_v45 = vpop.f32.mrf.mxu1 }
 0x1c5   :  { %757 = vadd.xlane.f32.xlu0 %v709_v44  ;;  %v640_v49 = vadd.f32 %v1608_v27, %v639_v45  ;;  %v715_v51 = vmul.f32 %v1613_v47, %v648_v43 }
 0x1c6   :  { %v1252_v48 = vpop.f32.mrf.mxu1 }
 0x1c7   :  { %v651_v50 = vadd.f32 %v1252_v48, %v1608_v27  ;;  %759 = vadd.xlane.f32.xlu1 %v710_v46  ;;  %v713_v57 = vmul.f32 %v1613_v47, %v640_v49 }
 0x1c8   :  { %v642_v52 = vpop.f32.mrf.mxu1 }
 0x1c9   :  { %v643_v53 = vadd.f32 %v1608_v27, %v642_v52  ;;  %769 = vadd.xlane.f32.xlu0 %v715_v51  ;;  %v716_v54 = vmul.f32 %v1613_v47, %v651_v50 }
 0x1ca   :  { %v1255_v55 = vpop.f32.mrf.mxu1 }
 0x1cb   :  { %v664_v56 = vadd.f32 %v1255_v55, %v1608_v27  ;;  %771 = vadd.xlane.f32.xlu1 %v716_v54  ;;  %v714_v59 = vmul.f32 %v1613_v47, %v643_v53 }
 0x1cc   :  { %v655_v58 = vpop.f32.mrf.mxu1 }
 0x1cd   :  { %765 = vadd.xlane.f32.xlu0 %v713_v57  ;;  %v656_v61 = vadd.f32 %v1608_v27, %v655_v58  ;;  %v719_v63 = vmul.f32 %v1613_v47, %v664_v56 }
 0x1ce   :  { %v1256_v60 = vpop.f32.mrf.mxu1 }
 0x1cf   :  { %v667_v62 = vadd.f32 %v1256_v60, %v1608_v27  ;;  %767 = vadd.xlane.f32.xlu1 %v714_v59  ;;  %v717_v4 = vmul.f32 %v1613_v47, %v656_v61 }
 0x1d0   :  { %v658_v0 = vpop.f32.mrf.mxu1 }
 0x1d1   :  { %v659_v1 = vadd.f32 %v1608_v27, %v658_v0  ;;  %777 = vadd.xlane.f32.xlu0 %v719_v63  ;;  %v720_v2 = vmul.f32 %v1613_v47, %v667_v62 }
 0x1d2   :  { %v1259_v3 = vpop.f32.mrf.mxu1 }
 0x1d3   :  { %779 = vadd.xlane.f32.xlu1 %v720_v2  ;;  %v718_v7 = vmul.f32 %v1613_v47, %v659_v1  ;;  %v680_v9 = vadd.f32 %v1259_v3, %v1608_v27 }
 0x1d4   :  { %v671_v5 = vpop.f32.mrf.mxu1 }
 0x1d5   :  { %v672_v6 = vadd.f32 %v1608_v27, %v671_v5  ;;  %773 = vadd.xlane.f32.xlu0 %v717_v4  ;;  %v723_v16 = vmul.f32 %v1613_v47, %v680_v9 }
 0x1d6   :  { %v1260_v8 = vpop.f32.mrf.mxu1 }
 0x1d7   :  { %v683_v10 = vadd.f32 %v1260_v8, %v1608_v27  ;;  %775 = vadd.xlane.f32.xlu1 %v718_v7  ;;  %v721_v11 = vmul.f32 %v1613_v47, %v672_v6 }
 0x1d8   :  { %v674_v12 = vpop.f32.mrf.mxu1 }
 0x1d9   :  { %v675_v13 = vadd.f32 %v1608_v27, %v674_v12  ;;  %781 = vadd.xlane.f32.xlu0 %v721_v11  ;;  %v724_v14 = vmul.f32 %v1613_v47, %v683_v10 }
 0x1db   :  { %v722_v15 = vmul.f32 %v1613_v47, %v675_v13 }
 0x1dd   :  { %783 = vadd.xlane.f32.xlu1 %v722_v15  ;;  %785 = vadd.xlane.f32.xlu0 %v723_v16 }
 0x1e1   :  { %787 = vadd.xlane.f32.xlu1 %v724_v14 }
 0x228   :  { %v730_v18 = vpop.xlane.xlu1 %729 }
 0x229   :  { %v798_v19 = vadd.f32 %v1679_v17, %v730_v18 }
 0x22a   :  { %v726_v20 = vpop.xlane.xlu0 %725 }
 0x22b   :  { %v1105_v21 = vmul.f32 -1.442695, %v798_v19  ;;  %v796_v22 = vadd.f32 %v1679_v17, %v726_v20 }
 0x22c   :  { %v732_v27 = vpop.xlane.xlu1 %731 }
 0x22d   :  { %1303 = vpow2.f32 %v1105_v21  ;;  %v1103_v23 = vmul.f32 -1.442695, %v796_v22  ;;  %v799_v24 = vadd.f32 %v1679_v17, %v732_v27 }
 0x22e   :  { %v728_v25 = vpop.xlane.xlu0 %727 }
 0x22f   :  { %1305 = vpow2.f32 %v1103_v23  ;;  %v1106_v47 = vmul.f32 -1.442695, %v799_v24  ;;  %v797_v26 = vadd.f32 %v1679_v17, %v728_v25 }
 0x231   :  { %1307 = vpow2.f32 %v1106_v47  ;;  %v1104_v28 = vmul.f32 -1.442695, %v797_v26 }
 0x232   :  { %v738_v29 = vpop.xlane.xlu0 %737 }
 0x233   :  { %1309 = vpow2.f32 %v1104_v28  ;;  %v802_v30 = vadd.f32 %v1679_v17, %v738_v29 }
 0x234   :  { %v740_v31 = vpop.xlane.xlu1 %739 }
 0x235   :  { %v1109_v32 = vmul.f32 -1.442695, %v802_v30  ;;  %v803_v33 = vadd.f32 %v1679_v17, %v740_v31 }
 0x236   :  { %v734_v34 = vpop.xlane.xlu0 %733 }
 0x237   :  { %1311 = vpow2.f32 %v1109_v32  ;;  %v1110_v35 = vmul.f32 -1.442695, %v803_v33  ;;  %v800_v36 = vadd.f32 %v1679_v17, %v734_v34 }
 0x238   :  { %v736_v37 = vpop.xlane.xlu1 %735 }
 0x239   :  { %1313 = vpow2.f32 %v1110_v35  ;;  %v1107_v38 = vmul.f32 -1.442695, %v800_v36  ;;  %v801_v39 = vadd.f32 %v1679_v17, %v736_v37 }
 0x23a   :  { %v1304_v40 = vpop.eup %1303  ;;  %v746_v41 = vpop.xlane.xlu0 %745 }
 0x23b   :  { %v926_v42 = vadd.f32 1.0, %v1304_v40  ;;  %1315 = vpow2.f32 %v1107_v38  ;;  %v1108_v43 = vmul.f32 -1.442695, %v801_v39  ;;  %v806_v44 = vadd.f32 %v1679_v17, %v746_v41 }
 0x23c   :  { %v1306_v45 = vpop.eup %1305  ;;  %v748_v46 = vpop.xlane.xlu1 %747 }
 0x23d   :  { %1317 = vrcp.f32 %v926_v42  ;;  %v924_v48 = vadd.f32 1.0, %v1306_v45  ;;  %v1113_v49 = vmul.f32 -1.442695, %v806_v44  ;;  %v807_v50 = vadd.f32 %v1679_v17, %v748_v46 }
 0x23e   :  { %v1308_v51 = vpop.eup %1307  ;;  %1319 = vpow2.f32 %v1108_v43  ;;  %v742_v52 = vpop.xlane.xlu0 %741 }
 0x23f   :  { %1321 = vrcp.f32 %v924_v48  ;;  %v927_v53 = vadd.f32 1.0, %v1308_v51  ;;  %v1114_v54 = vmul.f32 -1.442695, %v807_v50  ;;  %v804_v55 = vadd.f32 %v1679_v17, %v742_v52 }
 0x240   :  { %v1310_v56 = vpop.eup %1309  ;;  %1323 = vpow2.f32 %v1113_v49  ;;  %v744_v57 = vpop.xlane.xlu1 %743 }
 0x241   :  { %1325 = vrcp.f32 %v927_v53  ;;  %v925_v58 = vadd.f32 1.0, %v1310_v56  ;;  %v1111_v59 = vmul.f32 -1.442695, %v804_v55  ;;  %v805_v60 = vadd.f32 %v1679_v17, %v744_v57 }
 0x242   :  { %1327 = vpow2.f32 %v1114_v54  ;;  %v754_v61 = vpop.xlane.xlu0 %753 }
 0x243   :  { %1329 = vrcp.f32 %v925_v58  ;;  %v1112_v62 = vmul.f32 -1.442695, %v805_v60  ;;  %v810_v63 = vadd.f32 %v1679_v17, %v754_v61 }
 0x244   :  { %v1312_v0 = vpop.eup %1311  ;;  %1331 = vpow2.f32 %v1111_v59  ;;  %v756_v1 = vpop.xlane.xlu1 %755 }
 0x245   :  { %v930_v2 = vadd.f32 1.0, %v1312_v0  ;;  %1333 = vpow2.f32 %v1112_v62  ;;  %v1117_v3 = vmul.f32 -1.442695, %v810_v63  ;;  %v811_v4 = vadd.f32 %v1679_v17, %v756_v1 }
 0x246   :  { %v1314_v5 = vpop.eup %1313  ;;  %v750_v6 = vpop.xlane.xlu0 %749 }
 0x247   :  { %1335 = vrcp.f32 %v930_v2  ;;  %v931_v7 = vadd.f32 1.0, %v1314_v5  ;;  %v1118_v8 = vmul.f32 -1.442695, %v811_v4  ;;  %v808_v9 = vadd.f32 %v1679_v17, %v750_v6 }
 0x248   :  { %v1316_v10 = vpop.eup %1315  ;;  %1337 = vpow2.f32 %v1117_v3  ;;  %v752_v11 = vpop.xlane.xlu1 %751 }
 0x249   :  { %1339 = vrcp.f32 %v931_v7  ;;  %v928_v12 = vadd.f32 1.0, %v1316_v10  ;;  %v1115_v13 = vmul.f32 -1.442695, %v808_v9  ;;  %v809_v14 = vadd.f32 %v1679_v17, %v752_v11 }
 0x24a   :  { %v1318_v15 = vpop.eup %1317  ;;  %1341 = vpow2.f32 %v1118_v8  ;;  %v762_v16 = vpop.xlane.xlu0 %761 }
 0x24b   :  { %v1320_v18 = vpop.eup %1319  ;;  %1023 = vst.msk [vmem:[%s1848_s7 + $0x10] sm:$0xff] %vm1020_vm1, %v1318_v15  ;;  %1343 = vrcp.f32 %v928_v12  ;;  %v1116_v19 = vmul.f32 -1.442695, %v809_v14  ;;  %v814_v20 = vadd.f32 %v1679_v17, %v762_v16 }
 0x24c   :  { %v1322_v21 = vpop.eup %1321  ;;  %v929_v22 = vadd.f32 1.0, %v1320_v18  ;;  %1345 = vpow2.f32 %v1115_v13  ;;  %v764_v27 = vpop.xlane.xlu1 %763 }
 0x24d   :  { %v1324_v23 = vpop.eup %1323  ;;  %1021 = vst.msk [vmem:[%s1848_s7] sm:$0xff] %vm1020_vm1, %v1322_v21  ;;  %1347 = vpow2.f32 %v1116_v19  ;;  %v1121_v24 = vmul.f32 -1.442695, %v814_v20  ;;  %v815_v25 = vadd.f32 %v1679_v17, %v764_v27 }
 0x24e   :  { %v1326_v47 = vpop.eup %1325  ;;  %1349 = vrcp.f32 %v929_v22  ;;  %v934_v26 = vadd.f32 1.0, %v1324_v23  ;;  %v758_v28 = vpop.xlane.xlu0 %757 }
 0x24f   :  { %v1328_v29 = vpop.eup %1327  ;;  %1024 = vst.msk [vmem:[%s1848_s7 + $0x18] sm:$0xff] %vm1020_vm1, %v1326_v47  ;;  %1351 = vpow2.f32 %v1121_v24  ;;  %v1122_v30 = vmul.f32 -1.442695, %v815_v25  ;;  %v812_v31 = vadd.f32 %v1679_v17, %v758_v28 }
 0x250   :  { %v1330_v32 = vpop.eup %1329  ;;  %1353 = vrcp.f32 %v934_v26  ;;  %v935_v33 = vadd.f32 1.0, %v1328_v29  ;;  %v760_v34 = vpop.xlane.xlu1 %759 }
 0x251   :  { %v1332_v35 = vpop.eup %1331  ;;  %1022 = vst.msk [vmem:[%s1848_s7 + $0x8] sm:$0xff] %vm1020_vm1, %v1330_v32  ;;  %1355 = vpow2.f32 %v1122_v30  ;;  %v1119_v36 = vmul.f32 -1.442695, %v812_v31  ;;  %v813_v37 = vadd.f32 %v1679_v17, %v760_v34 }
 0x252   :  { %v1334_v38 = vpop.eup %1333  ;;  %1357 = vrcp.f32 %v935_v33  ;;  %v932_v39 = vadd.f32 1.0, %v1332_v35  ;;  %v770_v40 = vpop.xlane.xlu0 %769 }
 0x253   :  { %v933_v41 = vadd.f32 1.0, %v1334_v38  ;;  %1359 = vpow2.f32 %v1119_v36  ;;  %v1120_v42 = vmul.f32 -1.442695, %v813_v37  ;;  %v818_v43 = vadd.f32 %v1679_v17, %v770_v40 }
 0x254   :  { %v1336_v44 = vpop.eup %1335  ;;  %1361 = vrcp.f32 %v932_v39  ;;  %v772_v45 = vpop.xlane.xlu1 %771 }
 0x255   :  { %v1338_v46 = vpop.eup %1337  ;;  %1027 = vst.msk [vmem:[%s1848_s7 + $0x30] sm:$0xff] %vm1020_vm1, %v1336_v44  ;;  %1363 = vrcp.f32 %v933_v41  ;;  %v1125_v48 = vmul.f32 -1.442695, %v818_v43  ;;  %v819_v49 = vadd.f32 %v1679_v17, %v772_v45 }
 0x256   :  { %v1340_v50 = vpop.eup %1339  ;;  %v938_v51 = vadd.f32 1.0, %v1338_v46  ;;  %1365 = vpow2.f32 %v1120_v42  ;;  %v766_v52 = vpop.xlane.xlu0 %765 }
 0x257   :  { %v1342_v53 = vpop.eup %1341  ;;  %1028 = vst.msk [vmem:[%s1848_s7 + $0x38] sm:$0xff] %vm1020_vm1, %v1340_v50  ;;  %1367 = vpow2.f32 %v1125_v48  ;;  %v1126_v54 = vmul.f32 -1.442695, %v819_v49  ;;  %v816_v55 = vadd.f32 %v1679_v17, %v766_v52 }
 0x258   :  { %v1344_v56 = vpop.eup %1343  ;;  %1369 = vrcp.f32 %v938_v51  ;;  %v939_v57 = vadd.f32 1.0, %v1342_v53  ;;  %v768_v58 = vpop.xlane.xlu1 %767 }
 0x259   :  { %v1346_v59 = vpop.eup %1345  ;;  %1025 = vst.msk [vmem:[%s1848_s7 + $0x20] sm:$0xff] %vm1020_vm1, %v1344_v56  ;;  %1371 = vpow2.f32 %v1126_v54  ;;  %v1123_v60 = vmul.f32 -1.442695, %v816_v55  ;;  %v817_v61 = vadd.f32 %v1679_v17, %v768_v58 }
 0x25a   :  { %v1348_v62 = vpop.eup %1347  ;;  %1373 = vrcp.f32 %v939_v57  ;;  %v936_v63 = vadd.f32 1.0, %v1346_v59  ;;  %v778_v0 = vpop.xlane.xlu0 %777 }
 0x25b   :  { %v1350_v1 = vpop.eup %1349  ;;  %v937_v2 = vadd.f32 1.0, %v1348_v62  ;;  %1375 = vpow2.f32 %v1123_v60  ;;  %v1124_v3 = vmul.f32 -1.442695, %v817_v61  ;;  %v822_v4 = vadd.f32 %v1679_v17, %v778_v0 }
 0x25c   :  { %v1352_v5 = vpop.eup %1351  ;;  %1026 = vst.msk [vmem:[%s1848_s7 + $0x28] sm:$0xff] %vm1020_vm1, %v1350_v1  ;;  %1377 = vrcp.f32 %v936_v63  ;;  %v780_v6 = vpop.xlane.xlu1 %779 }
 0x25d   :  { %v1354_v7 = vpop.eup %1353  ;;  %1379 = vrcp.f32 %v937_v2  ;;  %v942_v8 = vadd.f32 1.0, %v1352_v5  ;;  %v1129_v9 = vmul.f32 -1.442695, %v822_v4  ;;  %v823_v10 = vadd.f32 %v1679_v17, %v780_v6 }
 0x25e   :  { %v1356_v11 = vpop.eup %1355  ;;  %1031 = vst.msk [vmem:[%s1848_s7 + $0x50] sm:$0xff] %vm1020_vm1, %v1354_v7  ;;  %1381 = vpow2.f32 %v1124_v3  ;;  %v774_v12 = vpop.xlane.xlu0 %773 }
 0x25f   :  { %v1358_v13 = vpop.eup %1357  ;;  %1383 = vrcp.f32 %v942_v8  ;;  %v943_v14 = vadd.f32 1.0, %v1356_v11  ;;  %v1130_v15 = vmul.f32 -1.442695, %v823_v10  ;;  %v820_v16 = vadd.f32 %v1679_v17, %v774_v12 }
 0x260   :  { %v1360_v18 = vpop.eup %1359  ;;  %1032 = vst.msk [vmem:[%s1848_s7 + $0x58] sm:$0xff] %vm1020_vm1, %v1358_v13  ;;  %1385 = vpow2.f32 %v1129_v9  ;;  %v776_v19 = vpop.xlane.xlu1 %775 }
 0x261   :  { %v1362_v20 = vpop.eup %1361  ;;  %1387 = vrcp.f32 %v943_v14  ;;  %v940_v21 = vadd.f32 1.0, %v1360_v18  ;;  %v1127_v22 = vmul.f32 -1.442695, %v820_v16  ;;  %v821_v27 = vadd.f32 %v1679_v17, %v776_v19 }
 0x262   :  { %v1364_v23 = vpop.eup %1363  ;;  %1029 = vst.msk [vmem:[%s1848_s7 + $0x40] sm:$0xff] %vm1020_vm1, %v1362_v20  ;;  %1389 = vpow2.f32 %v1130_v15  ;;  %v782_v24 = vpop.xlane.xlu0 %781 }
 0x263   :  { %v1366_v25 = vpop.eup %1365  ;;  %1030 = vst.msk [vmem:[%s1848_s7 + $0x48] sm:$0xff] %vm1020_vm1, %v1364_v23  ;;  %1391 = vrcp.f32 %v940_v21  ;;  %v1128_v47 = vmul.f32 -1.442695, %v821_v27  ;;  %v824_v26 = vadd.f32 %v1679_v17, %v782_v24 }
 0x264   :  { %v1368_v28 = vpop.eup %1367  ;;  %v941_v29 = vadd.f32 1.0, %v1366_v25  ;;  %1393 = vpow2.f32 %v1127_v22 }
 0x265   :  { %v1370_v30 = vpop.eup %1369  ;;  %v946_v31 = vadd.f32 1.0, %v1368_v28  ;;  %1395 = vpow2.f32 %v1128_v47  ;;  %v1131_v32 = vmul.f32 -1.442695, %v824_v26 }
 0x266   :  { %v1372_v33 = vpop.eup %1371  ;;  %1035 = vst.msk [vmem:[%s1848_s7 + $0x70] sm:$0xff] %vm1020_vm1, %v1370_v30  ;;  %1397 = vrcp.f32 %v941_v29  ;;  %v784_v34 = vpop.xlane.xlu1 %783 }
 0x267   :  { %v786_v35 = vpop.xlane.xlu0 %785  ;;  %v1374_v36 = vpop.eup %1373  ;;  %1399 = vrcp.f32 %v946_v31  ;;  %v947_v37 = vadd.f32 1.0, %v1372_v33  ;;  %v825_v38 = vadd.f32 %v1679_v17, %v784_v34 }
 0x268   :  { %v826_v39 = vadd.f32 %v1679_v17, %v786_v35  ;;  %v1376_v40 = vpop.eup %1375  ;;  %1036 = vst.msk [vmem:[%s1848_s7 + $0x78] sm:$0xff] %vm1020_vm1, %v1374_v36  ;;  %1401 = vpow2.f32 %v1131_v32 }
 0x269   :  { %v1378_v41 = vpop.eup %1377  ;;  %1403 = vrcp.f32 %v947_v37  ;;  %v944_v42 = vadd.f32 1.0, %v1376_v40  ;;  %v1132_v43 = vmul.f32 -1.442695, %v825_v38 }
 0x26a   :  { %v1133_v44 = vmul.f32 -1.442695, %v826_v39  ;;  %v1380_v45 = vpop.eup %1379  ;;  %1033 = vst.msk [vmem:[%s1848_s7 + $0x60] sm:$0xff] %vm1020_vm1, %v1378_v41  ;;  %v788_v46 = vpop.xlane.xlu1 %787 }
 0x26b   :  { %v1382_v48 = vpop.eup %1381  ;;  %1034 = vst.msk [vmem:[%s1848_s7 + $0x68] sm:$0xff] %vm1020_vm1, %v1380_v45  ;;  %1405 = vrcp.f32 %v944_v42  ;;  %v827_v49 = vadd.f32 %v1679_v17, %v788_v46 }
 0x26c   :  { %v1384_v50 = vpop.eup %1383  ;;  %v945_v51 = vadd.f32 1.0, %v1382_v48  ;;  %1407 = vpow2.f32 %v1132_v43 }
 0x26d   :  { %v1386_v52 = vpop.eup %1385  ;;  %1039 = vst.msk [vmem:[%s1848_s7 + $0x90] sm:$0xff] %vm1020_vm1, %v1384_v50  ;;  %1409 = vpow2.f32 %v1133_v44  ;;  %v1134_v53 = vmul.f32 -1.442695, %v827_v49 }
 0x26e   :  { %v1388_v54 = vpop.eup %1387  ;;  %1411 = vrcp.f32 %v945_v51  ;;  %v950_v55 = vadd.f32 1.0, %v1386_v52 }
 0x26f   :  { %v1390_v56 = vpop.eup %1389  ;;  %1040 = vst.msk [vmem:[%s1848_s7 + $0x98] sm:$0xff] %vm1020_vm1, %v1388_v54  ;;  %1413 = vpow2.f32 %v1134_v53 }
 0x270   :  { %v1392_v17 = vpop.eup %1391  ;;  %1415 = vrcp.f32 %v950_v55  ;;  %v951_v57 = vadd.f32 1.0, %v1390_v56 }
 0x271   :  { %v1394_v58 = vpop.eup %1393  ;;  %1037 = vst.msk [vmem:[%s1848_s7 + $0x80] sm:$0xff] %vm1020_vm1, %v1392_v17 }
 0x272   :  { %v1396_v59 = vpop.eup %1395  ;;  %1417 = vrcp.f32 %v951_v57  ;;  %v948_v60 = vadd.f32 1.0, %v1394_v58 }
 0x273   :  { %v1398_v61 = vpop.eup %1397  ;;  %v949_v62 = vadd.f32 1.0, %v1396_v59 }
 0x274   :  { %v1400_v63 = vpop.eup %1399  ;;  %1038 = vst.msk [vmem:[%s1848_s7 + $0x88] sm:$0xff] %vm1020_vm1, %v1398_v61  ;;  %1419 = vrcp.f32 %v948_v60 }
 0x275   :  { %v1402_v0 = vpop.eup %1401  ;;  %1043 = vst.msk [vmem:[%s1848_s7 + $0xb0] sm:$0xff] %vm1020_vm1, %v1400_v63  ;;  %1421 = vrcp.f32 %v949_v62 }
 0x276   :  { %v1404_v1 = vpop.eup %1403  ;;  %v952_v2 = vadd.f32 1.0, %v1402_v0 }
 0x277   :  { %1044 = vst.msk [vmem:[%s1848_s7 + $0xb8] sm:$0xff] %vm1020_vm1, %v1404_v1 }
 0x278   :  { %v1406_v3 = vpop.eup %1405  ;;  %1423 = vrcp.f32 %v952_v2 }
 0x279   :  { %v1408_v4 = vpop.eup %1407  ;;  %1041 = vst.msk [vmem:[%s1848_s7 + $0xa0] sm:$0xff] %vm1020_vm1, %v1406_v3 }
 0x27a   :  { %v1410_v5 = vpop.eup %1409  ;;  %v953_v6 = vadd.f32 1.0, %v1408_v4 }
 0x27b   :  { %v1412_v7 = vpop.eup %1411  ;;  %v954_v8 = vadd.f32 1.0, %v1410_v5 }
 0x27c   :  { %v1414_v9 = vpop.eup %1413  ;;  %1042 = vst.msk [vmem:[%s1848_s7 + $0xa8] sm:$0xff] %vm1020_vm1, %v1412_v7  ;;  %1425 = vrcp.f32 %v953_v6 }
 0x27d   :  { %v1416_v10 = vpop.eup %1415  ;;  %1427 = vrcp.f32 %v954_v8  ;;  %v955_v11 = vadd.f32 1.0, %v1414_v9 }
 0x27e   :  { %1047 = vst.msk [vmem:[%s1848_s7 + $0xd0] sm:$0xff] %vm1020_vm1, %v1416_v10 }
 0x27f   :  { %v1418_v12 = vpop.eup %1417  ;;  %1429 = vrcp.f32 %v955_v11 }
 0x280   :  { %1048 = vst.msk [vmem:[%s1848_s7 + $0xd8] sm:$0xff] %vm1020_vm1, %v1418_v12 }
 0x281   :  { %v1420_v13 = vpop.eup %1419 }
 0x282   :  { %v1422_v14 = vpop.eup %1421  ;;  %1045 = vst.msk [vmem:[%s1848_s7 + $0xc0] sm:$0xff] %vm1020_vm1, %v1420_v13 }
 0x283   :  { %1046 = vst.msk [vmem:[%s1848_s7 + $0xc8] sm:$0xff] %vm1020_vm1, %v1422_v14 }
 0x285   :  { %v1424_v15 = vpop.eup %1423 }
 0x286   :  { %1049 = vst.msk [vmem:[%s1848_s7 + $0xe0] sm:$0xff] %vm1020_vm1, %v1424_v15 }
 0x289   :  { %v1426_v16 = vpop.eup %1425 }
 0x28a   :  { %v1428_v18 = vpop.eup %1427  ;;  %1050 = vst.msk [vmem:[%s1848_s7 + $0xe8] sm:$0xff] %vm1020_vm1, %v1426_v16 }
 0x28b   :  { %1051 = vst.msk [vmem:[%s1848_s7 + $0xf0] sm:$0xff] %vm1020_vm1, %v1428_v18 }
 0x28c   :  { %v1430_v19 = vpop.eup %1429 }
 0x28d   :  { %1052 = vst.msk [vmem:[%s1848_s7 + $0xf8] sm:$0xff] %vm1020_vm1, %v1430_v19 }

</bundles_post_ra>
